<compile_context>
chip_gen: v7x
topology: tpu7x:2x2x1
jax: 0.10.0
libtpu: 0.0.40
codegen_flags: <defaults>
</compile_context>

<pallas_src>
import math
import functools

import jax
import jax.numpy as jnp
from jax.experimental import pallas as pl
from jax.experimental.pallas import tpu as pltpu

LANE = 128
SUBLANE = 8
MAX_BATCH_TILE = 4096


def _round_up(x, m):
    return ((x + m - 1) // m) * m


def _choose_batch_tiling(B):
    """Returns (b_tile, b_padded). Single tile for small/medium B, else balanced tiles."""
    b8 = _round_up(max(B, SUBLANE), SUBLANE)
    if b8 <= MAX_BATCH_TILE:
        return b8, b8
    n_tiles = -(-b8 // MAX_BATCH_TILE)
    b_tile = _round_up(-(-b8 // n_tiles), SUBLANE)
    return b_tile, n_tiles * b_tile


# ----------------------------- Pallas kernel ---------------------------------

def _mlp_q_kernel(x_ref, w1_ref, b1_ref, w2_ref, b2_ref, wh_ref, bh_ref, o_ref,
                  *, action_dim, dueling):
    """Fused MLP Q-network for one batch tile.

    x_ref:  [Bt, S]        f32  (cast to bf16 in-kernel for the MXU)
    w*_ref: [in, out]      bf16 (MXU operands), VMEM-resident across grid steps
    b*_ref: [1, out]       f32  (bias / ReLU / dueling math in f32)
    o_ref:  [Bt, OUT_PAD]  f32  narrow padded output slab (OUT_PAD = round_up(head, 8))
    """
    x = x_ref[...].astype(jnp.bfloat16)
    h1 = jnp.dot(x, w1_ref[...], preferred_element_type=jnp.float32) + b1_ref[...]
    h1 = jnp.maximum(h1, 0.0)
    h2 = jnp.dot(h1.astype(jnp.bfloat16), w2_ref[...],
                 preferred_element_type=jnp.float32) + b2_ref[...]
    h2 = jnp.maximum(h2, 0.0)
    head = jnp.dot(h2.astype(jnp.bfloat16), wh_ref[...],
                   preferred_element_type=jnp.float32) + bh_ref[...]
    if dueling:
        # head columns: [0, A) = advantage, A = value, [A+1, OUT_PAD) = exact zeros
        # (head weight/bias zero-padded in pack_params), so a full-lane sum minus
        # the value column is exactly the advantage sum.
        value = head[:, action_dim:action_dim + 1]
        adv_sum = jnp.sum(head, axis=-1, keepdims=True) - value
        adv_mean = adv_sum * (1.0 / action_dim)
        head = head + (value - adv_mean)  # cols [0, A) = value + (adv - mean)
    o_ref[...] = head.astype(o_ref.dtype)


# --------------------------- one-time weight packing ---------------------------

def pack_params(params, dueling_mode=False):
    """Hoists all per-call weight preprocessing out of the hot path.

    Returns (packed_params, action_dim). packed_params = (w1_bf16, b1_f32, w2_bf16,
    b2_f32, w_head_bf16, b_head_f32) with the head weight/bias laid out [adv | value]
    and zero-padded to a multiple of 8 columns (the dueling kernel relies on those
    pad columns being exactly zero).
    """
    if dueling_mode:
        w1, b1, w2, b2, wv, bv, wa, ba = params
        action_dim = wa.shape[1]
        w_head = jnp.concatenate([wa, wv], axis=1)   # [adv | value]
        b_head = jnp.concatenate([ba, bv], axis=1)
    else:
        w1, b1, w2, b2, w3, b3 = params
        action_dim = w3.shape[1]
        w_head, b_head = w3, b3

    head_width = w_head.shape[1]
    out_pad = _round_up(head_width, SUBLANE)
    w_head = jnp.pad(w_head, ((0, 0), (0, out_pad - head_width)))
    b_head = jnp.pad(b_head, ((0, 0), (0, out_pad - head_width)))

    packed = (
        jnp.asarray(w1, jnp.bfloat16), jnp.asarray(b1, jnp.float32),
        jnp.asarray(w2, jnp.bfloat16), jnp.asarray(b2, jnp.float32),
        jnp.asarray(w_head, jnp.bfloat16), jnp.asarray(b_head, jnp.float32),
    )
    return packed, action_dim


# ------------------------------ Python wrapper --------------------------------

@functools.partial(jax.jit, static_argnames=("action_dim", "dueling_mode"))
def mlp_q_forward(state, packed_params, action_dim, dueling_mode=False):
    """state: [B, state_dim] f32.  Returns [B, action_dim] f32."""
    w1_b, b1_f, w2_b, b2_f, wh_b, bh_f = packed_params
    B, S = state.shape
    H1 = w1_b.shape[1]
    H2 = w2_b.shape[1]
    out_pad = wh_b.shape[1]

    b_tile, b_padded = _choose_batch_tiling(B)
    if b_padded != B:
        state = jnp.pad(state, ((0, b_padded - B), (0, 0)))
    grid = (b_padded // b_tile,)

    def _resident(shape):
        # Full-array block, same block index every grid step -> DMA'd once and
        # kept in VMEM across the batch grid.
        return pl.BlockSpec(shape, lambda i: (0, 0))

    kernel = functools.partial(_mlp_q_kernel, action_dim=action_dim,
                               dueling=dueling_mode)

    flops = 2 * b_padded * (S * H1 + H1 * H2 + H2 * out_pad)
    bytes_accessed = (b_padded * S * 4                            # f32 state in
                      + (S * H1 + H1 * H2 + H2 * out_pad) * 2     # bf16 weights
                      + (H1 + H2 + out_pad) * 4                   # f32 biases
                      + b_padded * out_pad * 4)                   # f32 output
    cost = pl.CostEstimate(flops=flops, transcendentals=0,
                           bytes_accessed=bytes_accessed)

    out_padded = pl.pallas_call(
        kernel,
        out_shape=jax.ShapeDtypeStruct((b_padded, out_pad), jnp.float32),
        grid=grid,
        in_specs=[
            pl.BlockSpec((b_tile, S), lambda i: (i, 0)),
            _resident(w1_b.shape), _resident(b1_f.shape),
            _resident(w2_b.shape), _resident(b2_f.shape),
            _resident(wh_b.shape), _resident(bh_f.shape),
        ],
        out_specs=pl.BlockSpec((b_tile, out_pad), lambda i: (i, 0)),
        compiler_params=pltpu.CompilerParams(
            dimension_semantics=("parallel",),   # batch tiles across TCs (v7x)
            vmem_limit_bytes=32 * 1024 * 1024,
        ),
        cost_estimate=cost,
    )(state, w1_b, b1_f, w2_b, b2_f, wh_b, bh_f)

    # Pad rows/cols carry bias-driven garbage; nothing downstream may read them.
    return out_padded[:B, :action_dim]


# --------------------------- deterministic init --------------------------------

def _xavier_uniform(key, fan_in, fan_out, gain=1.0):
    # Matches torch.nn.init.xavier_uniform_ (gain * sqrt(6/(fan_in+fan_out)))
    bound = gain * math.sqrt(6.0 / (fan_in + fan_out))
    # stored as [in, out] (transposed vs torch Linear weight)
    return jax.random.uniform(key, (fan_in, fan_out), jnp.float32, -bound, bound)


def init_params(key, state_dim, action_dim, hidden_sizes=(64, 64), dueling_mode=False):
    keys = jax.random.split(key, 8)
    w1 = _xavier_uniform(keys[0], state_dim, hidden_sizes[0])
    b1 = jnp.zeros((1, hidden_sizes[0]), jnp.float32)
    w2 = _xavier_uniform(keys[1], hidden_sizes[0], hidden_sizes[1])
    b2 = jnp.zeros((1, hidden_sizes[1]), jnp.float32)
    if dueling_mode:
        wv = _xavier_uniform(keys[2], hidden_sizes[1], 1)
        bv = jnp.zeros((1, 1), jnp.float32)
        wa = _xavier_uniform(keys[3], hidden_sizes[1], action_dim)
        ba = jnp.zeros((1, action_dim), jnp.float32)
        return (w1, b1, w2, b2, wv, bv, wa, ba)
    else:
        w3 = _xavier_uniform(keys[2], hidden_sizes[1], action_dim)
        b3 = jnp.zeros((1, action_dim), jnp.float32)
        return (w1, b1, w2, b2, w3, b3)


# ------------------------------ pure-JAX reference -----------------------------

def ref_forward(state, params, dueling_mode=False):
    if dueling_mode:
        w1, b1, w2, b2, wv, bv, wa, ba = params
        h = jnp.maximum(state @ w1 + b1, 0.0)
        h = jnp.maximum(h @ w2 + b2, 0.0)
        value = h @ wv + bv
        adv = h @ wa + ba
        return value + (adv - jnp.mean(adv, axis=-1, keepdims=True))
    else:
        w1, b1, w2, b2, w3, b3 = params
        h = jnp.maximum(state @ w1 + b1, 0.0)
        h = jnp.maximum(h @ w2 + b2, 0.0)
        return h @ w3 + b3


# ----------------------------------- main --------------------------------------

if __name__ == "__main__":
    key = jax.random.PRNGKey(0)
    k_state, k_state2, k_state3, k_param, k_param_d = jax.random.split(key, 5)

    batch, state_dim, action_dim = 8, 16, 4
    hidden_sizes = (64, 64)

    state = jax.random.normal(k_state, (batch, state_dim), jnp.float32)

    # Non-dueling (module default)
    params = init_params(k_param, state_dim, action_dim, hidden_sizes, dueling_mode=False)
    packed, adim = pack_params(params, dueling_mode=False)        # one-time packing
    out = jax.block_until_ready(mlp_q_forward(state, packed, adim, dueling_mode=False))
    ref = ref_forward(state, params, dueling_mode=False)
    assert out.shape == (batch, action_dim)
    # bf16 MXU operands vs f32 reference -> loosened tolerance
    assert jnp.allclose(out, ref, atol=3e-2, rtol=3e-2), float(jnp.max(jnp.abs(out - ref)))

    # Dueling head
    params_d = init_params(k_param_d, state_dim, action_dim, hidden_sizes, dueling_mode=True)
    packed_d, adim_d = pack_params(params_d, dueling_mode=True)
    out_d = jax.block_until_ready(mlp_q_forward(state, packed_d, adim_d, dueling_mode=True))
    ref_d = ref_forward(state, params_d, dueling_mode=True)
    assert out_d.shape == (batch, action_dim)
    assert jnp.allclose(out_d, ref_d, atol=3e-2, rtol=3e-2), float(jnp.max(jnp.abs(out_d - ref_d)))

    # Medium batch not a multiple of 8's tile -> pad to 600, single grid step.
    big_state = jax.random.normal(k_state2, (600, state_dim), jnp.float32)
    out_big = jax.block_until_ready(mlp_q_forward(big_state, packed_d, adim_d, dueling_mode=True))
    ref_big = ref_forward(big_state, params_d, dueling_mode=True)
    assert out_big.shape == (600, action_dim)
    assert jnp.allclose(out_big, ref_big, atol=3e-2, rtol=3e-2), \
        float(jnp.max(jnp.abs(out_big - ref_big)))

    # Large batch -> balanced multi-tile parallel grid with VMEM-resident weights.
    huge_state = jax.random.normal(k_state3, (4100, state_dim), jnp.float32)
    out_huge = jax.block_until_ready(mlp_q_forward(huge_state, packed_d, adim_d, dueling_mode=True))
    ref_huge = ref_forward(huge_state, params_d, dueling_mode=True)
    assert out_huge.shape == (4100, action_dim)
    assert jnp.allclose(out_huge, ref_huge, atol=3e-2, rtol=3e-2), \
        float(jnp.max(jnp.abs(out_huge - ref_huge)))

    print("KERNEL_OK")
</pallas_src>

<mosaic_0001>
module attributes {stable_mosaic.version = 11 : i64} {
  func.func @_mlp_q_kernel(%arg0: i32, %arg1: memref<8x16xf32, #tpu.memory_space<vmem>>, %arg2: memref<16x64xbf16, #tpu.memory_space<vmem>>, %arg3: memref<1x64xf32, #tpu.memory_space<vmem>>, %arg4: memref<64x64xbf16, #tpu.memory_space<vmem>>, %arg5: memref<1x64xf32, #tpu.memory_space<vmem>>, %arg6: memref<64x8xbf16, #tpu.memory_space<vmem>>, %arg7: memref<1x8xf32, #tpu.memory_space<vmem>>, %arg8: memref<8x8xf32, #tpu.memory_space<vmem>>) attributes {dimension_semantics = [#tpu.dimension_semantics<parallel>], iteration_bounds = array<i64: 1>, scalar_prefetch = 0 : i64, scratch_operands = 0 : i64, tpu.core_type = #tpu.core_type<tc>, window_params = [{transform_indices = @transform_0, window_bounds = array<i64: 8, 16>}, {pipeline_mode = #tpu.pipeline_mode<synchronous>, transform_indices = @transform_1, window_bounds = array<i64: 16, 64>}, {pipeline_mode = #tpu.pipeline_mode<synchronous>, transform_indices = @transform_2, window_bounds = array<i64: 1, 64>}, {pipeline_mode = #tpu.pipeline_mode<synchronous>, transform_indices = @transform_3, window_bounds = array<i64: 64, 64>}, {pipeline_mode = #tpu.pipeline_mode<synchronous>, transform_indices = @transform_4, window_bounds = array<i64: 1, 64>}, {pipeline_mode = #tpu.pipeline_mode<synchronous>, transform_indices = @transform_5, window_bounds = array<i64: 64, 8>}, {pipeline_mode = #tpu.pipeline_mode<synchronous>, transform_indices = @transform_6, window_bounds = array<i64: 1, 8>}, {transform_indices = @transform_7, window_bounds = array<i64: 8, 8>}]} {
    %c0 = arith.constant 0 : index
    %c0_0 = arith.constant 0 : index
    %0 = vector.load %arg1[%c0, %c0_0] : memref<8x16xf32, #tpu.memory_space<vmem>>, vector<8x16xf32>
    %1 = arith.truncf %0 : vector<8x16xf32> to vector<8x16xbf16>
    %c0_1 = arith.constant 0 : index
    %c0_2 = arith.constant 0 : index
    %2 = vector.load %arg2[%c0_1, %c0_2] : memref<16x64xbf16, #tpu.memory_space<vmem>>, vector<16x64xbf16>
    %cst = arith.constant dense<0.000000e+00> : vector<8x64xf32>
    %3 = tpu.matmul %1, %2, %cst {dimension_numbers = #tpu.dot_dimension_numbers<[1], [0], [0], [1], [0, 0, 1, 1], [], []>} : vector<8x16xbf16>, vector<16x64xbf16>, vector<8x64xf32> -> vector<8x64xf32>
    %c0_3 = arith.constant 0 : index
    %c0_4 = arith.constant 0 : index
    %4 = vector.load %arg3[%c0_3, %c0_4] : memref<1x64xf32, #tpu.memory_space<vmem>>, vector<1x64xf32>
    %5 = vector.broadcast %4 : vector<1x64xf32> to vector<8x64xf32>
    %6 = arith.addf %3, %5 : vector<8x64xf32>
    %cst_5 = arith.constant 0.000000e+00 : f32
    %7 = vector.broadcast %cst_5 : f32 to vector<8x64xf32>
    %8 = arith.maximumf %6, %7 : vector<8x64xf32>
    %9 = arith.truncf %8 : vector<8x64xf32> to vector<8x64xbf16>
    %c0_6 = arith.constant 0 : index
    %c0_7 = arith.constant 0 : index
    %10 = vector.load %arg4[%c0_6, %c0_7] : memref<64x64xbf16, #tpu.memory_space<vmem>>, vector<64x64xbf16>
    %cst_8 = arith.constant dense<0.000000e+00> : vector<8x64xf32>
    %11 = tpu.matmul %9, %10, %cst_8 {dimension_numbers = #tpu.dot_dimension_numbers<[1], [0], [0], [1], [0, 0, 1, 1], [], []>} : vector<8x64xbf16>, vector<64x64xbf16>, vector<8x64xf32> -> vector<8x64xf32>
    %c0_9 = arith.constant 0 : index
    %c0_10 = arith.constant 0 : index
    %12 = vector.load %arg5[%c0_9, %c0_10] : memref<1x64xf32, #tpu.memory_space<vmem>>, vector<1x64xf32>
    %13 = vector.broadcast %12 : vector<1x64xf32> to vector<8x64xf32>
    %14 = arith.addf %11, %13 : vector<8x64xf32>
    %cst_11 = arith.constant 0.000000e+00 : f32
    %15 = vector.broadcast %cst_11 : f32 to vector<8x64xf32>
    %16 = arith.maximumf %14, %15 : vector<8x64xf32>
    %17 = arith.truncf %16 : vector<8x64xf32> to vector<8x64xbf16>
    %c0_12 = arith.constant 0 : index
    %c0_13 = arith.constant 0 : index
    %18 = vector.load %arg6[%c0_12, %c0_13] : memref<64x8xbf16, #tpu.memory_space<vmem>>, vector<64x8xbf16>
    %cst_14 = arith.constant dense<0.000000e+00> : vector<8x8xf32>
    %19 = tpu.matmul %17, %18, %cst_14 {dimension_numbers = #tpu.dot_dimension_numbers<[1], [0], [0], [1], [0, 0, 1, 1], [], []>} : vector<8x64xbf16>, vector<64x8xbf16>, vector<8x8xf32> -> vector<8x8xf32>
    %c0_15 = arith.constant 0 : index
    %c0_16 = arith.constant 0 : index
    %20 = vector.load %arg7[%c0_15, %c0_16] : memref<1x8xf32, #tpu.memory_space<vmem>>, vector<1x8xf32>
    %21 = vector.broadcast %20 : vector<1x8xf32> to vector<8x8xf32>
    %22 = arith.addf %19, %21 : vector<8x8xf32>
    %c0_17 = arith.constant 0 : index
    %c0_18 = arith.constant 0 : index
    %23 = vector.load %arg8[%c0_17, %c0_18] : memref<8x8xf32, #tpu.memory_space<vmem>>, vector<8x8xf32>
    tpu.vector_store %arg8[%c0_17, %c0_18], %22 {strides = array<i32>} : memref<8x8xf32, #tpu.memory_space<vmem>>, vector<8x8xf32>,
    return
  }
  func.func @transform_0(%arg0: i32) -> (i32, i32) {
    %c0_i32 = arith.constant 0 : i32
    %c0_i32_0 = arith.constant 0 : i32
    return %arg0, %c0_i32 : i32, i32
  }
  func.func @transform_1(%arg0: i32) -> (i32, i32) {
    %c0_i32 = arith.constant 0 : i32
    %c0_i32_0 = arith.constant 0 : i32
    %c0_i32_1 = arith.constant 0 : i32
    return %c0_i32, %c0_i32_0 : i32, i32
  }
  func.func @transform_2(%arg0: i32) -> (i32, i32) {
    %c0_i32 = arith.constant 0 : i32
    %c0_i32_0 = arith.constant 0 : i32
    %c0_i32_1 = arith.constant 0 : i32
    return %c0_i32, %c0_i32_0 : i32, i32
  }
  func.func @transform_3(%arg0: i32) -> (i32, i32) {
    %c0_i32 = arith.constant 0 : i32
    %c0_i32_0 = arith.constant 0 : i32
    %c0_i32_1 = arith.constant 0 : i32
    return %c0_i32, %c0_i32_0 : i32, i32
  }
  func.func @transform_4(%arg0: i32) -> (i32, i32) {
    %c0_i32 = arith.constant 0 : i32
    %c0_i32_0 = arith.constant 0 : i32
    %c0_i32_1 = arith.constant 0 : i32
    return %c0_i32, %c0_i32_0 : i32, i32
  }
  func.func @transform_5(%arg0: i32) -> (i32, i32) {
    %c0_i32 = arith.constant 0 : i32
    %c0_i32_0 = arith.constant 0 : i32
    %c0_i32_1 = arith.constant 0 : i32
    return %c0_i32, %c0_i32_0 : i32, i32
  }
  func.func @transform_6(%arg0: i32) -> (i32, i32) {
    %c0_i32 = arith.constant 0 : i32
    %c0_i32_0 = arith.constant 0 : i32
    %c0_i32_1 = arith.constant 0 : i32
    return %c0_i32, %c0_i32_0 : i32, i32
  }
  func.func @transform_7(%arg0: i32) -> (i32, i32) {
    %c0_i32 = arith.constant 0 : i32
    %c0_i32_0 = arith.constant 0 : i32
    return %arg0, %c0_i32 : i32, i32
  }
}

</mosaic_0001>

<bundles_post_ra>
// kernel: mlp_q_forward.1
= control target key start
LH: loop header
LB: loop body
LE: loop exit
PB: predicated region body
PF: predicated region fallthrough
CT: control target
= control target key end

     0   :  { %12 = vsyncpa [#allocation3], 0  ;;  %s373_s24 = smov [#allocation2]   ;;  %s471_s0 = inlined_call_operand.vmem [shape: f32[8,16], index: 0, kind: input, shape index: {}]   ;;  %s472_s1 = inlined_call_operand.hbm [shape: bf16[16,64], index: 1, kind: input, shape index: {}]   ;;  %s473_s2 = inlined_call_operand.vmem [shape: f32[1,64], index: 2, kind: input, shape index: {}]   ;;  %s474_s3 = inlined_call_operand.vmem [shape: bf16[64,64], index: 3, kind: input, shape index: {}]   ;;  %s475_s4 = inlined_call_operand.vmem [shape: f32[1,64], index: 4, kind: input, shape index: {}]   ;;  %s476_s5 = inlined_call_operand.vmem [shape: bf16[64,8], index: 5, kind: input, shape index: {}]   ;;  %s477_s6 = inlined_call_operand.vmem [shape: f32[1,8], index: 6, kind: input, shape index: {}]   ;;  %s478_s7 = inlined_call_operand.vmem [shape: f32[8,8], index: 7, kind: output, shape index: {}]  }
   0x1   :  { %s20_s25 = sshll.u32 %s373_s24, 4  ;;  %s349_s28 = scalar_lea.hbm %s472_s1, 128  ;;  %s21_s25 = int_to_ptr.vmem [resolvable:$true] %s20_s25 }
   0x2   :  { %p350_p0 = scmp.ne.s32.totalorder %s472_s1, %s349_s28  ;;  %p353_p1 = scmp.lt.u32.totalorder %s349_s28, %s472_s1 }
   0x4   :  { %p355_p2 = pnand %p353_p1, %p350_p0 }
   0x6   :  { %358 = shalt.err (!%p355_p2)
}
   0x7   :  { %s359_s10 = scalar_lea.vmem %s21_s25, 128  ;;  %p364_p4 = scmp.lt.s32.totalorder %s21_s25, %s21_s25 }
   0x8   :  { %p360_p3 = scmp.ne.s32.totalorder %s21_s25, %s359_s10  ;;  %p365_p5 = scmp.lt.s32.totalorder %s359_s10, %s359_s10 }
   0xa   :  { %p366_p6 = por %p365_p5, %p364_p4 }
   0xc   :  { %p367_p7 = pnand %p366_p6, %p360_p3 }
   0xe   :  { %370 = shalt.err (!%p367_p7)
}
   0xf   :  { %s374_s11 = smov 64   ;;  %s375_s12 = smov 4  }
  0x10   :  { %26 = dma.hbm_to_vmem [thread:$0]  %s472_s1, 128, %s21_s25, [#allocation3], %s374_s11, %s374_s11, %s375_s12  }
  0x11   :  { %371 = dma.done.wait [#allocation3], 128  }
  0x12   :  { %372 = vsyncadd [#allocation3], 4294967168  ;;  %v376_v0 = vmov 0.0   ;;  %vm377_vm0 = vmmov 0   ;;  %v340_v1 = vld [vmem:[#allocation2] sm:$0xff]   ;;  %vm58_vm1 = vcmask 130048  }
  0x13   :  { %305 = vmatprep.subr.bf16.mxu0 %v376_v0  ;;  %307 = vmatprep.mubr.msk.bf16.mxu0 %vm377_vm0, %v376_v0  ;;  %v41_v2 = vld [vmem:[%s471_s0] sm:$0xff]  ;;  %v342_v5 = vld [vmem:[%s474_s3 + $0x8] sm:$0xff]   ;;  %v343_v6 = vld [vmem:[%s474_s3 + $0x10] sm:$0xff]   ;;  %vm143_vm2 = vcmask 523264   ;;  %vm271_vm3 = vcmask 64512  }
  0x14   :  { %311 = vmatprep.subr.bf16.mxu1 %v376_v0  ;;  %319 = vmatprep.mubr.msk.bf16.mxu1 %vm377_vm0, %v376_v0  ;;  %v42_v3 = vpack.c.bf16 %v41_v2, %v41_v2  ;;  %v341_v4 = vld [vmem:[%s474_s3] sm:$0xff]   ;;  %v344_v7 = vld [vmem:[%s474_s3 + $0x18] sm:$0xff]   ;;  %v346_v9 = vld [vmem:[%s476_s5 + $0x8] sm:$0xff]  }
  0x15   :  { %306 = vmatpush3.bf16.msra.mxu0 %v340_v1  ;;  %312 = vmatpush3.bf16.msra.mxu1 %v341_v4  ;;  %v345_v8 = vld [vmem:[%s476_s5] sm:$0xff]   ;;  %v347_v18 = vld [vmem:[%s476_s5 + $0x10] sm:$0xff]   ;;  %v348_v19 = vld [vmem:[%s476_s5 + $0x18] sm:$0xff]  }
  0x16   :  { %323 = vmatprep.subr.bf16.mxu0 %v376_v0  ;;  %313 = vmatprep.subr.bf16.mxu1 %v376_v0  ;;  %v278_v10 = vld [vmem:[%s473_s2] ss:$0 sm:$0xff] }
  0x17   :  { %v281_v20 = vld [vmem:[%s475_s4] ss:$0 sm:$0xff] }
  0x18   :  { %308 = vmatmul.mubr.msk.bf16.vlgmr.msra.gmra.mrb[0].mxu0 %vm58_vm1, %v42_v3  ;;  %v287_v28 = vld [vmem:[%s477_s6] ss:$0 sm:$0xff] }
  0x19   :  { %331 = vmatprep.mubr.msk.bf16.mxu0 %vm377_vm0, %v376_v0  ;;  %314 = vmatpush3.bf16.msra.mxu1 %v342_v5 }
  0x1a   :  { %315 = vmatprep.subr.bf16.mxu1 %v376_v0  ;;  %324 = vmatpush3.bf16.msra.mxu0 %v345_v8 }
  0x1b   :  { %325 = vmatprep.subr.bf16.mxu0 %v376_v0 }
  0x1d   :  { %316 = vmatpush3.bf16.msra.mxu1 %v343_v6 }
  0x1e   :  { %317 = vmatprep.subr.bf16.mxu1 %v376_v0  ;;  %326 = vmatpush3.bf16.msra.mxu0 %v346_v9 }
  0x1f   :  { %327 = vmatprep.subr.bf16.mxu0 %v376_v0 }
  0x21   :  { %318 = vmatpush3.bf16.msra.mxu1 %v344_v7 }
  0x22   :  { %328 = vmatpush3.bf16.msra.mxu0 %v347_v18 }
  0x23   :  { %329 = vmatprep.subr.bf16.mxu0 %v376_v0 }
  0x26   :  { %330 = vmatpush3.bf16.msra.mxu0 %v348_v19 }
  0xeb   :  { %v96_v11 = vpop.f32.mrb[0].mxu0 }
  0xec   :  { %v97_v12 = vadd.f32 %v278_v10, %v96_v11  ;;  %v309_v13 = vpop.f32.mrb[1].mxu0 }
  0xed   :  { %v99_v14 = vpop.f32.mrb[2].mxu0 }
  0xee   :  { %v102_v15 = vmax.f32 %v97_v12, 0.0  ;;  %v310_v16 = vpop.f32.mrb[3].mxu0 }
  0xf0   :  { %v103_v17 = vpack.c.bf16 %v102_v15, %v102_v15 }
  0xf2   :  { %320 = vmatmul.mubr.msk.bf16.vlgmr.msra.gmra.mrb[0].mxu1 %vm143_vm2, %v103_v17 }
 0x1c5   :  { %v181_v21 = vpop.f32.mrb[0].mxu1 }
 0x1c6   :  { %v182_v22 = vadd.f32 %v281_v20, %v181_v21  ;;  %v321_v23 = vpop.f32.mrb[1].mxu1 }
 0x1c7   :  { %v184_v24 = vpop.f32.mrb[2].mxu1 }
 0x1c8   :  { %v187_v25 = vmax.f32 %v182_v22, 0.0  ;;  %v322_v26 = vpop.f32.mrb[3].mxu1 }
 0x1ca   :  { %v188_v27 = vpack.c.bf16 %v187_v25, %v187_v25 }
 0x1cc   :  { %332 = vmatmul.mubr.msk.bf16.vlgmr.msra.gmra.mrb[4].mxu0 %vm143_vm2, %v188_v27 }
 0x29f   :  { %v265_v29 = vpop.f32.mrb[4].mxu0 }
 0x2a0   :  { %v266_v30 = vadd.f32 %v287_v28, %v265_v29  ;;  %v333_v31 = vpop.f32.mrb[5].mxu0 }
 0x2a1   :  { %v268_v32 = vpop.f32.mrb[6].mxu0 }
 0x2a2   :  { %272 = vst.msk [vmem:[%s478_s7] sm:$0xff] %vm271_vm3, %v266_v30  ;;  %v334_v33 = vpop.f32.mrb[7].mxu0 }
 0x2a3   :  { %277 = vsyncpa [#allocation3], 1 }

</bundles_post_ra>
